<compile_context>
chip_gen: v7x
topology: tpu7x:2x2x1
jax: 0.10.0
libtpu: 0.0.40
codegen_flags: <defaults>
</compile_context>

<pallas_src>
import functools

import jax
import jax.numpy as jnp
from jax import lax
from jax.experimental import pallas as pl
from jax.experimental.pallas import tpu as pltpu


def _choose_tile_n(n, c, target_slab_bytes=2 << 20, max_rows=16384):
    """Row tile giving ~2 MiB (tile_n, C) f32 working slabs.

    Measured mem-bound Pallas kernels reach ~85-86% of HBM roofline at 1-4 MiB
    blocks (vs ~63% at 256 KiB) and each grid step costs ~0.35 us, so bigger is
    better until VMEM pressure bites.  2 MiB f32 slabs keep (2 logit inputs x
    2 pipeline buffers) + ~4-6 live f32 temporaries comfortably inside v7x's
    64 MiB physical VMEM.  tile_n is a multiple of 16 so bf16 inputs stay
    sublane-packed (also a multiple of 8, fine for f32/int32).
    """
    if n <= 16:
        return n
    t = max(16, target_slab_bytes // (c * 4))
    t = min(t, max_rows, n)
    t = max(16, (t // 16) * 16)
    return n if t >= n else t


def _custom_loss_kernel(label_ref, flag_ref, logit_blk, logit_ref_blk, out_ref, *,
                        n_rows, tile_n, tiles_per_split,
                        neg_a1_over_n, w2, w3, mask_ragged, have_empty):
    core = pl.program_id(0)          # row-split ("parallel") axis
    step = pl.program_id(1)          # per-core row-tile ("arbitrary") axis
    t_idx = core * tiles_per_split + step          # nominal global row-tile index
    tile_start = t_idx * tile_n

    @pl.when(step == 0)
    def _init():
        out_ref[...] = jnp.zeros_like(out_ref)

    def _compute_and_accumulate():
        t, c = logit_blk.shape
        row_acc = jnp.zeros((t, 1), jnp.float32)
        need_kl = (w2 != 0.0) or (w3 != 0.0)

        # ---- reference softmax first: log_pr is reduced and dropped before
        # ---- p / log_p are materialized (fewer live (T, C) f32 slabs). -------
        if need_kl:
            xr = logit_ref_blk[...].astype(jnp.float32)
            zr = xr - jnp.max(xr, axis=-1, keepdims=True)
            ezr = jnp.exp(zr)
            ser = jnp.sum(ezr, axis=-1, keepdims=True)
            pr = ezr * pl.reciprocal(ser)              # softmax(logit_ref)
            if w2 != 0.0:
                # KLDivLoss(prob, prob_ref) elem = pr*(log pr - p); +pr*log_pr half.
                log_pr = zr - jnp.log(ser)
                row_acc += jnp.sum(pr * log_pr, axis=-1, keepdims=True) * w2
                # log_pr dead from here.

        # ---- main softmax ----------------------------------------------------
        x = logit_blk[...].astype(jnp.float32)
        z = x - jnp.max(x, axis=-1, keepdims=True)
        ez = jnp.exp(z)
        se = jnp.sum(ez, axis=-1, keepdims=True)
        log_p = z - jnp.log(se)                        # log softmax(logit)

        if neg_a1_over_n != 0.0:
            # CrossEntropyLoss(logit, label), mean over N, scaled by runtime flag.
            # Out-of-range labels silently contribute 0 (PyTorch would raise).
            col = lax.broadcasted_iota(jnp.int32, (t, c), 1)
            ce_rows = jnp.sum(jnp.where(col == label_ref[...], log_p, 0.0),
                              axis=-1, keepdims=True)
            row_acc += ce_rows * (flag_ref[0] * neg_a1_over_n)

        if need_kl:
            p = ez * pl.reciprocal(se)                 # softmax(logit)
            if w3 != 0.0:
                # KLDivLoss(prob_ref, prob) elem = p*(log p - pr); +p*log_p half.
                row_acc += jnp.sum(p * log_p, axis=-1, keepdims=True) * w3
            # Shared cross term: -w2*pr*p - w3*p*pr in a single reduction.
            row_acc += jnp.sum(p * pr, axis=-1, keepdims=True) * (-(w2 + w3))

        if mask_ragged:
            # Only the tile that extends past N takes the masked path.  The mask
            # is a select on the (T, 1) per-row sums (never a multiply: garbage
            # padded rows may hold NaN/Inf after exp/log).
            is_full = tile_start + tile_n <= n_rows

            @pl.when(is_full)
            def _full():
                out_ref[...] += jnp.sum(row_acc)

            @pl.when(jnp.logical_not(is_full))
            def _ragged():
                rows = tile_start + lax.broadcasted_iota(jnp.int32, (t, 1), 0)
                out_ref[...] += jnp.sum(jnp.where(rows < n_rows, row_acc, 0.0))
        else:
            out_ref[...] += jnp.sum(row_acc)

    if have_empty:
        # Grid padding from the 2-core split: fully-empty duplicate tiles exist.
        # Their input block index is clamped to the previous one (pipeline skips
        # the DMA) and the compute is skipped here.
        pl.when(tile_start < n_rows)(_compute_and_accumulate)
    else:
        _compute_and_accumulate()


def custom_loss(label, logit, logit_ref, flag,
                alpha1=1.0, alpha2=0.0, alpha3=0.0,
                tile_n=None, num_row_splits=2, logit_buffering=None):
    """Pallas TPU forward of CustomLoss.

    Inputs are consumed in their stored dtype (keep logits bf16 end-to-end when
    possible — the kernel is HBM-bound and casts to f32 per tile in VMEM).
    `logit_buffering` optionally sets pipeline depth (pl.Buffered(k)) on the two
    logit inputs for sweeping on v5e/v6e.
    """
    n, c = logit.shape
    assert logit_ref.shape == (n, c)
    if tile_n is None:
        tile_n = _choose_tile_n(n, c)
    grid_n = pl.cdiv(n, tile_n)

    # Split the row loop across (up to) two TensorCores: ~2x on v7x (2 TC/chip),
    # a plain sequential outer loop (near-free) on v5e/v6e (1 TC).
    num_splits = max(1, min(num_row_splits, grid_n))
    tiles_per_split = pl.cdiv(grid_n, num_splits)
    have_empty = num_splits * tiles_per_split > grid_n
    mask_ragged = (n % tile_n) != 0

    label2 = label.astype(jnp.int32).reshape(n, 1)
    flag_arr = jnp.asarray(flag, jnp.float32).reshape(1)

    def row_block(spl, stp):
        # Clamp so padded (empty) tiles reuse the previous block index: the
        # pipeline then skips the DMA and the kernel skips the compute.
        return (jnp.minimum(spl * tiles_per_split + stp, grid_n - 1), 0)

    def logit_spec():
        if logit_buffering is None:
            return pl.BlockSpec((tile_n, c), row_block)
        return pl.BlockSpec((tile_n, c), row_block,
                            pipeline_mode=pl.Buffered(logit_buffering))

    kernel = functools.partial(
        _custom_loss_kernel,
        n_rows=n, tile_n=tile_n, tiles_per_split=tiles_per_split,
        neg_a1_over_n=-float(alpha1) / n,      # CE 'mean' over N (sign folded in)
        w2=float(alpha2) / (n * c),            # KLDiv 'mean' over all N*C elems
        w3=float(alpha3) / (n * c),
        mask_ragged=mask_ragged, have_empty=have_empty)

    itemsize = jnp.dtype(logit.dtype).itemsize
    # VMEM budget: 2 logit inputs x 2 pipeline buffers + label blocks + ~6 live
    # f32 (tile_n, C) temporaries + headroom.  Explicit limit clears v5e's
    # 16 MiB scoped default; defaults here stay well under v7x's 64 MiB physical.
    vmem_est = (2 * 2 * tile_n * c * itemsize + 2 * 2 * tile_n * 4
                + 6 * tile_n * c * 4 + (2 << 20))
    vmem_limit = int(max(32 << 20, min(vmem_est, 100 << 20)))

    cost = pl.CostEstimate(
        flops=int(10 * n * c),
        transcendentals=int(2 * n * c),
        bytes_accessed=int(2 * n * c * itemsize + n * 4 + 4))

    out = pl.pallas_call(
        kernel,
        out_shape=jax.ShapeDtypeStruct((num_splits, 8, 128), jnp.float32),
        grid=(num_splits, tiles_per_split),
        in_specs=[
            pl.BlockSpec((tile_n, 1), row_block),     # label     (N, 1) int32
            pl.BlockSpec(memory_space=pltpu.SMEM),    # flag      (1,)   f32
            logit_spec(),                             # logit     (N, C)
            logit_spec(),                             # logit_ref (N, C)
        ],
        # Per-core resident accumulator block (revisited along the arbitrary axis,
        # indexed by the parallel core axis).
        out_specs=pl.BlockSpec((1, 8, 128), lambda spl, stp: (spl, 0, 0)),
        compiler_params=pltpu.CompilerParams(
            dimension_semantics=("parallel", "arbitrary"),
            vmem_limit_bytes=vmem_limit),
        cost_estimate=cost,
    )(label2, flag_arr, logit, logit_ref)

    # Every element of partial block `s` holds core s's partial sum.
    return jnp.sum(out[:, 0, 0])


def _reference_loss(label, logit, logit_ref, flag,
                    alpha1=1.0, alpha2=0.0, alpha3=0.0):
    # Pure-JAX mirror of the PyTorch forward (correctness check only).
    logit = logit.astype(jnp.float32)
    logit_ref = logit_ref.astype(jnp.float32)
    log_p = jax.nn.log_softmax(logit, axis=-1)
    log_pr = jax.nn.log_softmax(logit_ref, axis=-1)
    p = jnp.exp(log_p)
    pr = jnp.exp(log_pr)
    ce = -jnp.mean(jnp.take_along_axis(log_p, label[:, None].astype(jnp.int32),
                                       axis=-1))
    kl2 = jnp.mean(pr * (log_pr - p))   # KLDivLoss(prob, prob_ref), 'mean'
    kl3 = jnp.mean(p * (log_p - pr))    # KLDivLoss(prob_ref, prob), 'mean'
    return alpha1 * flag * ce + alpha2 * kl2 + alpha3 * kl3


if __name__ == "__main__":
    key = jax.random.PRNGKey(0)
    alpha1, alpha2, alpha3 = 1.0, 0.5, 0.25   # exercise all three terms
    ks = jax.random.split(key, 9)

    # Case 1: small, single-tile path (module's (N, C) convention).
    n1, c1 = 8, 32
    flag1 = jnp.float32(1.0)
    logit1 = jax.random.normal(ks[0], (n1, c1), jnp.float32)
    logit_r1 = jax.random.normal(ks[1], (n1, c1), jnp.float32)
    label1 = jax.random.randint(ks[2], (n1,), 0, c1, jnp.int32)
    got1 = jax.block_until_ready(
        custom_loss(label1, logit1, logit_r1, flag1, alpha1, alpha2, alpha3))
    ref1 = _reference_loss(label1, logit1, logit_r1, flag1, alpha1, alpha2, alpha3)
    assert jnp.allclose(got1, ref1, atol=1e-5, rtol=1e-5), (got1, ref1)

    # Case 2: multi-tile, 2-way row split, ragged last tile + a skipped empty
    # padded tile: N=20 rows, tile_n=8 -> 3 real tiles over a (2, 2) grid.
    n2, c2 = 20, 128
    flag2 = jnp.float32(1.0)
    logit2 = jax.random.normal(ks[3], (n2, c2), jnp.float32)
    logit_r2 = jax.random.normal(ks[4], (n2, c2), jnp.float32)
    label2 = jax.random.randint(ks[5], (n2,), 0, c2, jnp.int32)
    got2 = jax.block_until_ready(
        custom_loss(label2, logit2, logit_r2, flag2, alpha1, alpha2, alpha3,
                    tile_n=8))
    ref2 = _reference_loss(label2, logit2, logit_r2, flag2, alpha1, alpha2, alpha3)
    assert jnp.allclose(got2, ref2, atol=1e-5, rtol=1e-5), (got2, ref2)

    # Case 3: bf16 logits end-to-end, even 2-way split, runtime flag scaling.
    n3, c3 = 64, 256
    flag3 = jnp.float32(0.5)
    logit3 = jax.random.normal(ks[6], (n3, c3), jnp.float32).astype(jnp.bfloat16)
    logit_r3 = jax.random.normal(ks[7], (n3, c3), jnp.float32).astype(jnp.bfloat16)
    label3 = jax.random.randint(ks[8], (n3,), 0, c3, jnp.int32)
    got3 = jax.block_until_ready(
        custom_loss(label3, logit3, logit_r3, flag3, alpha1, alpha2, alpha3,
                    tile_n=16))
    ref3 = _reference_loss(label3, logit3, logit_r3, flag3, alpha1, alpha2, alpha3)
    assert jnp.allclose(got3, ref3, atol=1e-4, rtol=1e-4), (got3, ref3)

    print("KERNEL_OK")
</pallas_src>

<mosaic_0001>
module attributes {stable_mosaic.version = 11 : i64} {
  func.func @_custom_loss_kernel(%arg0: i32, %arg1: i32, %arg2: memref<8x1xi32, #tpu.memory_space<vmem>>, %arg3: memref<1xf32, #tpu.memory_space<smem>>, %arg4: memref<8x32xf32, #tpu.memory_space<vmem>>, %arg5: memref<8x32xf32, #tpu.memory_space<vmem>>, %arg6: memref<1x8x128xf32, #tpu.memory_space<vmem>>) attributes {dimension_semantics = [#tpu.dimension_semantics<parallel>, #tpu.dimension_semantics<arbitrary>], iteration_bounds = array<i64: 1, 1>, scalar_prefetch = 0 : i64, scratch_operands = 0 : i64, tpu.core_type = #tpu.core_type<tc>, window_params = [{transform_indices = @transform_0, window_bounds = array<i64: 8, 1>}, {transform_indices = @transform_1, window_bounds = array<i64: 1>}, {transform_indices = @transform_2, window_bounds = array<i64: 8, 32>}, {transform_indices = @transform_3, window_bounds = array<i64: 8, 32>}, {transform_indices = @transform_4, window_bounds = array<i64: 1, 8, 128>}]} {
    %c0_i32 = arith.constant 0 : i32
    %0 = arith.cmpi eq, %arg1, %c0_i32 : i32
    %1 = arith.extui %0 : i1 to i32
    %c0_i32_0 = arith.constant 0 : i32
    %2 = arith.cmpi ne, %1, %c0_i32_0 : i32
    scf.if %2 {
      %cst_27 = arith.constant 0.000000e+00 : f32
      %71 = vector.broadcast %cst_27 : f32 to vector<1x8x128xf32>
      %c0_28 = arith.constant 0 : index
      %c0_29 = arith.constant 0 : index
      %c0_30 = arith.constant 0 : index
      %72 = vector.load %arg6[%c0_28, %c0_29, %c0_30] : memref<1x8x128xf32, #tpu.memory_space<vmem>>, vector<1x8x128xf32>
      tpu.vector_store %arg6[%c0_28, %c0_29, %c0_30], %71 {strides = array<i32>} : memref<1x8x128xf32, #tpu.memory_space<vmem>>, vector<1x8x128xf32>,
    } else {
    }
    %cst = arith.constant 0.000000e+00 : f32
    %3 = vector.broadcast %cst : f32 to vector<8x1xf32>
    %c0 = arith.constant 0 : index
    %c0_1 = arith.constant 0 : index
    %4 = vector.load %arg5[%c0, %c0_1] : memref<8x32xf32, #tpu.memory_space<vmem>>, vector<8x32xf32>
    %cst_2 = arith.constant dense<0xFF800000> : vector<8xf32>
    %5 = vector.multi_reduction <maximumf>, %4, %cst_2 [1] : vector<8x32xf32> to vector<8xf32>
    %6 = vector.shape_cast %5 : vector<8xf32> to vector<8x1xf32>
    %7 = vector.broadcast %6 : vector<8x1xf32> to vector<8x32xf32>
    %8 = arith.subf %4, %7 : vector<8x32xf32>
    %9 = math.exp %8 : vector<8x32xf32>
    %cst_3 = arith.constant dense<0.000000e+00> : vector<8xf32>
    %10 = vector.multi_reduction <add>, %9, %cst_3 [1] : vector<8x32xf32> to vector<8xf32>
    %11 = vector.shape_cast %10 : vector<8xf32> to vector<8x1xf32>
    %12 = tpu.reciprocal %11 : vector<8x1xf32> -> vector<8x1xf32>
    %13 = vector.broadcast %12 : vector<8x1xf32> to vector<8x32xf32>
    %14 = arith.mulf %9, %13 : vector<8x32xf32>
    %15 = math.log %11 : vector<8x1xf32>
    %16 = vector.broadcast %15 : vector<8x1xf32> to vector<8x32xf32>
    %17 = arith.subf %8, %16 : vector<8x32xf32>
    %18 = arith.mulf %14, %17 : vector<8x32xf32>
    %cst_4 = arith.constant dense<0.000000e+00> : vector<8xf32>
    %19 = vector.multi_reduction <add>, %18, %cst_4 [1] : vector<8x32xf32> to vector<8xf32>
    %20 = vector.shape_cast %19 : vector<8xf32> to vector<8x1xf32>
    %cst_5 = arith.constant 0.001953125 : f32
    %21 = vector.broadcast %cst_5 : f32 to vector<8x1xf32>
    %22 = arith.mulf %20, %21 : vector<8x1xf32>
    %23 = arith.addf %3, %22 : vector<8x1xf32>
    %c0_6 = arith.constant 0 : index
    %c0_7 = arith.constant 0 : index
    %24 = vector.load %arg4[%c0_6, %c0_7] : memref<8x32xf32, #tpu.memory_space<vmem>>, vector<8x32xf32>
    %cst_8 = arith.constant dense<0xFF800000> : vector<8xf32>
    %25 = vector.multi_reduction <maximumf>, %24, %cst_8 [1] : vector<8x32xf32> to vector<8xf32>
    %26 = vector.shape_cast %25 : vector<8xf32> to vector<8x1xf32>
    %27 = vector.broadcast %26 : vector<8x1xf32> to vector<8x32xf32>
    %28 = arith.subf %24, %27 : vector<8x32xf32>
    %29 = math.exp %28 : vector<8x32xf32>
    %cst_9 = arith.constant dense<0.000000e+00> : vector<8xf32>
    %30 = vector.multi_reduction <add>, %29, %cst_9 [1] : vector<8x32xf32> to vector<8xf32>
    %31 = vector.shape_cast %30 : vector<8xf32> to vector<8x1xf32>
    %32 = math.log %31 : vector<8x1xf32>
    %33 = vector.broadcast %32 : vector<8x1xf32> to vector<8x32xf32>
    %34 = arith.subf %28, %33 : vector<8x32xf32>
    %35 = tpu.iota {dimensions = array<i32: 1>} : vector<8x32xi32>
    %c0_10 = arith.constant 0 : index
    %c0_11 = arith.constant 0 : index
    %36 = vector.load %arg2[%c0_10, %c0_11] : memref<8x1xi32, #tpu.memory_space<vmem>>, vector<8x1xi32>
    %37 = vector.broadcast %36 : vector<8x1xi32> to vector<8x32xi32>
    %38 = arith.cmpi eq, %35, %37 : vector<8x32xi32>
    %cst_12 = arith.constant 0.000000e+00 : f32
    %39 = vector.broadcast %cst_12 : f32 to vector<8x32xf32>
    %40 = arith.select %38, %34, %39 : vector<8x32xi1>, vector<8x32xf32>
    %cst_13 = arith.constant dense<0.000000e+00> : vector<8xf32>
    %41 = vector.multi_reduction <add>, %40, %cst_13 [1] : vector<8x32xf32> to vector<8xf32>
    %42 = vector.shape_cast %41 : vector<8xf32> to vector<8x1xf32>
    %c0_14 = arith.constant 0 : index
    %43 = memref.load %arg3[%c0_14] : memref<1xf32, #tpu.memory_space<smem>>
    %cst_15 = arith.constant -1.250000e-01 : f32
    %44 = arith.mulf %43, %cst_15 : f32
    %45 = vector.broadcast %44 : f32 to vector<8x1xf32>
    %46 = arith.mulf %42, %45 : vector<8x1xf32>
    %47 = arith.addf %23, %46 : vector<8x1xf32>
    %48 = tpu.reciprocal %31 : vector<8x1xf32> -> vector<8x1xf32>
    %49 = vector.broadcast %48 : vector<8x1xf32> to vector<8x32xf32>
    %50 = arith.mulf %29, %49 : vector<8x32xf32>
    %51 = arith.mulf %50, %34 : vector<8x32xf32>
    %cst_16 = arith.constant dense<0.000000e+00> : vector<8xf32>
    %52 = vector.multi_reduction <add>, %51, %cst_16 [1] : vector<8x32xf32> to vector<8xf32>
    %53 = vector.shape_cast %52 : vector<8xf32> to vector<8x1xf32>
    %cst_17 = arith.constant 9.765625E-4 : f32
    %54 = vector.broadcast %cst_17 : f32 to vector<8x1xf32>
    %55 = arith.mulf %53, %54 : vector<8x1xf32>
    %56 = arith.addf %47, %55 : vector<8x1xf32>
    %57 = arith.mulf %50, %14 : vector<8x32xf32>
    %cst_18 = arith.constant dense<0.000000e+00> : vector<8xf32>
    %58 = vector.multi_reduction <add>, %57, %cst_18 [1] : vector<8x32xf32> to vector<8xf32>
    %59 = vector.shape_cast %58 : vector<8xf32> to vector<8x1xf32>
    %cst_19 = arith.constant -0.0029296875 : f32
    %60 = vector.broadcast %cst_19 : f32 to vector<8x1xf32>
    %61 = arith.mulf %59, %60 : vector<8x1xf32>
    %62 = arith.addf %56, %61 : vector<8x1xf32>
    %c0_20 = arith.constant 0 : index
    %c0_21 = arith.constant 0 : index
    %c0_22 = arith.constant 0 : index
    %63 = vector.load %arg6[%c0_20, %c0_21, %c0_22] : memref<1x8x128xf32, #tpu.memory_space<vmem>>, vector<1x8x128xf32>
    %64 = vector.shape_cast %62 : vector<8x1xf32> to vector<1x8x1xf32>
    %cst_23 = arith.constant dense<0.000000e+00> : vector<1xf32>
    %65 = vector.multi_reduction <add>, %64, %cst_23 [1, 2] : vector<1x8x1xf32> to vector<1xf32>
    %66 = vector.shape_cast %65 : vector<1xf32> to vector<1x1x1xf32>
    %67 = vector.extract %66[0, 0, 0] : f32 from vector<1x1x1xf32>
    %68 = vector.broadcast %67 : f32 to vector<1x8x128xf32>
    %69 = arith.addf %63, %68 : vector<1x8x128xf32>
    %c0_24 = arith.constant 0 : index
    %c0_25 = arith.constant 0 : index
    %c0_26 = arith.constant 0 : index
    %70 = vector.load %arg6[%c0_24, %c0_25, %c0_26] : memref<1x8x128xf32, #tpu.memory_space<vmem>>, vector<1x8x128xf32>
    tpu.vector_store %arg6[%c0_24, %c0_25, %c0_26], %69 {strides = array<i32>} : memref<1x8x128xf32, #tpu.memory_space<vmem>>, vector<1x8x128xf32>,
    return
  }
  func.func @transform_0(%arg0: i32, %arg1: i32) -> (i32, i32) {
    %c1_i32 = arith.constant 1 : i32
    %0 = arith.muli %arg0, %c1_i32 : i32
    %1 = arith.addi %0, %arg1 : i32
    %c0_i32 = arith.constant 0 : i32
    %2 = arith.minsi %1, %c0_i32 : i32
    %c0_i32_0 = arith.constant 0 : i32
    %c0_i32_1 = arith.constant 0 : i32
    return %2, %c0_i32_0 : i32, i32
  }
  func.func @transform_1(%arg0: i32, %arg1: i32) -> i32 {
    %c0_i32 = arith.constant 0 : i32
    %c0_i32_0 = arith.constant 0 : i32
    return %c0_i32 : i32
  }
  func.func @transform_2(%arg0: i32, %arg1: i32) -> (i32, i32) {
    %c1_i32 = arith.constant 1 : i32
    %0 = arith.muli %arg0, %c1_i32 : i32
    %1 = arith.addi %0, %arg1 : i32
    %c0_i32 = arith.constant 0 : i32
    %2 = arith.minsi %1, %c0_i32 : i32
    %c0_i32_0 = arith.constant 0 : i32
    %c0_i32_1 = arith.constant 0 : i32
    return %2, %c0_i32_0 : i32, i32
  }
  func.func @transform_3(%arg0: i32, %arg1: i32) -> (i32, i32) {
    %c1_i32 = arith.constant 1 : i32
    %0 = arith.muli %arg0, %c1_i32 : i32
    %1 = arith.addi %0, %arg1 : i32
    %c0_i32 = arith.constant 0 : i32
    %2 = arith.minsi %1, %c0_i32 : i32
    %c0_i32_0 = arith.constant 0 : i32
    %c0_i32_1 = arith.constant 0 : i32
    return %2, %c0_i32_0 : i32, i32
  }
  func.func @transform_4(%arg0: i32, %arg1: i32) -> (i32, i32, i32) {
    %c0_i32 = arith.constant 0 : i32
    %c0_i32_0 = arith.constant 0 : i32
    %c0_i32_1 = arith.constant 0 : i32
    return %arg0, %c0_i32, %c0_i32_0 : i32, i32, i32
  }
}

</mosaic_0001>

<bundles_post_ra>
// kernel: tpu_custom_call.1
= control target key start
LH: loop header
LB: loop body
LE: loop exit
PB: predicated region body
PF: predicated region fallthrough
CT: control target
= control target key end

     0   :  { %vm106_vm0 = vcmask 261120   ;;  %s318_s0 = inlined_call_operand.vmem [shape: s32[8,1], index: 0, kind: input, shape index: {}]   ;;  %s319_s1 = inlined_call_operand.<no memory space> [shape: f32[1], index: 1, kind: input, shape index: {}]   ;;  %s320_s2 = inlined_call_operand.vmem [shape: f32[8,32], index: 2, kind: input, shape index: {}]   ;;  %s321_s3 = inlined_call_operand.vmem [shape: f32[8,32], index: 3, kind: input, shape index: {}]   ;;  %s322_s4 = inlined_call_operand.hbm [shape: f32[1,8,128], index: 4, kind: output, shape index: {}]  }
   0x1   :  { %v105_v0 = vld [vmem:[%s321_s3] sm:$0xff] }
   0x2   :  { %v127_v1 = vld [vmem:[%s320_s2] sm:$0xff] }
   0x3   :  { %10 = vsyncpa [#allocation4], 0  ;;  %v107_v2 = vsel %vm106_vm0, %v105_v0, -inf  ;;  %v128_v3 = vsel %vm106_vm0, %v127_v1, -inf  ;;  %v142_v4 = vld [vmem:[%s318_s0] sm:$0xff]  ;;  %v259_v5 = vmov 0   ;;  %v140_v18 = vlaneseq }
   0x4   :  { %108 = vmax.xlane.f32.xlu0 %v107_v2  ;;  %s152_s3 = smul.f32 -0.125, %s319_s1  ;;  %vm171_vm2 = vcmask 7168   ;;  %s260_s1 = smov [#allocation3]  }
   0x5   :  { %222 = vset.pattern.permute.xlu0 %v259_v5  ;;  %v141_v21 = vand.u32 127, %v140_v18  ;;  %s191_s21 = sshll.u32 %s260_s1, 4  ;;  %s192_s21 = int_to_ptr.vmem [resolvable:$true] %s191_s21 }
   0x6   :  { %v153_v41 = vstv %s152_s3  ;;  %s235_s23 = scalar_lea.vmem %s192_s21, 128  ;;  %p240_p1 = scmp.lt.s32.totalorder %s192_s21, %s192_s21 }
   0x7   :  { %p236_p0 = scmp.ne.s32.totalorder %s192_s21, %s235_s23  ;;  %p241_p2 = scmp.lt.s32.totalorder %s235_s23, %s235_s23 }
   0x8   :  { %129 = vmax.xlane.f32.xlu0 %v128_v3 }
   0x9   :  { %p242_p3 = por %p241_p2, %p240_p1 }
   0xb   :  { %p243_p4 = pnand %p242_p3, %p236_p0 }
  0x1e   :  { %144 = vperm.xlu0 %222, %v142_v4  }
  0x91   :  { %v109_v6 = vpop.xlane.xlu0 %108 }
  0x92   :  { %v110_v7 = vsub.f32 %v105_v0, %v109_v6 }
  0x94   :  { %v111_v8 = vmul.f32 1.442695, %v110_v7 }
  0x95   :  { %v130_v9 = vpop.xlane.xlu0 %129 }
  0x96   :  { %223 = vpow2.f32 %v111_v8  ;;  %v131_v10 = vsub.f32 %v127_v1, %v130_v9 }
  0x98   :  { %v132_v11 = vmul.f32 1.442695, %v131_v10 }
  0x9a   :  { %225 = vpow2.f32 %v132_v11 }
  0x9d   :  { %v145_v22 = vpop.permute.xlu0 %144 }
  0x9e   :  { %vm146_vm1 = vcmp.eq.s32.totalorder %v141_v21, %v145_v22 }
  0xa0   :  { %v224_v12 = vpop.eup %223 }
  0xa1   :  { %v113_v13 = vsel %vm106_vm0, %v224_v12, 0.0 }
  0xa2   :  { %114 = vadd.xlane.f32.xlu1 %v113_v13 }
  0xa4   :  { %v226_v14 = vpop.eup %225 }
  0xa5   :  { %v134_v15 = vsel %vm106_vm0, %v226_v14, 0.0 }
  0xa6   :  { %135 = vadd.xlane.f32.xlu1 %v134_v15 }
 0x12f   :  { %v115_v16 = vpop.xlane.xlu1 %114 }
 0x130   :  { %227 = vlog2.f32 %v115_v16 }
 0x133   :  { %v136_v17 = vpop.xlane.xlu1 %135 }
 0x134   :  { %229 = vlog2.f32 %v136_v17 }
 0x135   :  { %231 = vrcp.f32 %v115_v16 }
 0x136   :  { %233 = vrcp.f32 %v136_v17 }
 0x13a   :  { %v228_v19 = vpop.eup %227 }
 0x13b   :  { %v119_v20 = vmul.f32 0.6931472, %v228_v19 }
 0x13d   :  { %v120_v26 = vsub.f32 %v110_v7, %v119_v20 }
 0x13e   :  { %v230_v23 = vpop.eup %229 }
 0x13f   :  { %v232_v24 = vpop.eup %231  ;;  %v138_v25 = vmul.f32 0.6931472, %v230_v23 }
 0x140   :  { %v117_v28 = vmul.f32 %v232_v24, %v224_v12  ;;  %v234_v29 = vpop.eup %233 }
 0x141   :  { %v139_v27 = vsub.f32 %v131_v10, %v138_v25  ;;  %v157_v33 = vmul.f32 %v234_v29, %v226_v14 }
 0x142   :  { %v121_v32 = vmul.f32 %v120_v26, %v117_v28 }
 0x143   :  { %v147_v30 = vsel %vm146_vm1, %v139_v27, 0.0  ;;  %v158_v35 = vmul.f32 %v157_v33, %v139_v27  ;;  %v164_v37 = vmul.f32 %v157_v33, %v117_v28 }
 0x144   :  { %v148_v31 = vsel %vm106_vm0, %v147_v30, 0.0  ;;  %v122_v34 = vsel %vm106_vm0, %v121_v32, 0.0 }
 0x145   :  { %149 = vadd.xlane.f32.xlu1 %v148_v31  ;;  %v159_v36 = vsel %vm106_vm0, %v158_v35, 0.0  ;;  %v165_v38 = vsel %vm106_vm0, %v164_v37, 0.0 }
 0x149   :  { %123 = vadd.xlane.f32.xlu1 %v122_v34 }
 0x14d   :  { %160 = vadd.xlane.f32.xlu1 %v159_v36 }
 0x151   :  { %166 = vadd.xlane.f32.xlu1 %v165_v38 }
 0x1d2   :  { %v150_v39 = vpop.xlane.xlu1 %149 }
 0x1d3   :  { %v154_v44 = vmul.f32 %v153_v41, %v150_v39 }
 0x1d6   :  { %v124_v40 = vpop.xlane.xlu1 %123 }
 0x1d7   :  { %v125_v42 = vmul.f32 0.001953125, %v124_v40 }
 0x1d9   :  { %v155_v46 = vadd.f32 %v154_v44, %v125_v42 }
 0x1da   :  { %v161_v43 = vpop.xlane.xlu1 %160 }
 0x1db   :  { %v162_v45 = vmul.f32 0.0009765625, %v161_v43 }
 0x1dd   :  { %v163_v48 = vadd.f32 %v162_v45, %v155_v46 }
 0x1de   :  { %v167_v47 = vpop.xlane.xlu1 %166 }
 0x1df   :  { %v168_v49 = vmul.f32 -0.0029296875, %v167_v47 }
 0x1e1   :  { %v169_v50 = vadd.f32 %v168_v49, %v163_v48 }
 0x1e3   :  { %v172_v51 = vsel %vm171_vm2, %v169_v50, 0.0 }
 0x1e4   :  { %173 = vadd.xlane.f32.xlu1 %v172_v51 }
 0x271   :  { %v174_v52 = vpop.xlane.xlu1 %173 }
 0x272   :  { %v175_v53 = vrot.slane %v174_v52, 4 }
 0x274   :  { %v176_v54 = vadd.f32 %v175_v53, %v174_v52 }
 0x276   :  { %v177_v55 = vrot.slane %v176_v54, 2 }
 0x278   :  { %v178_v56 = vadd.f32 %v177_v55, %v176_v54 }
 0x27a   :  { %v179_v57 = vrot.slane %v178_v56, 1 }
 0x27c   :  { %v180_v58 = vadd.f32 %v179_v57, %v178_v56 }
 0x27e   :  { %217 = vpush %v180_v58 }
 0x2af   :  { %s218_s22 = spop %217 }
 0x2b0   :  { %v182_v59 = vstv %s218_s22 }
 0x2b1   :  { %184 = vst [vmem:[#allocation3] sm:$0xff] %v182_v59 }
 0x2b2   :  { %246 = shalt.err (!%p243_p4)
}
 0x2b3   :  { %s247_s26 = scalar_lea.hbm %s322_s4, 128 }
 0x2b4   :  { %p248_p5 = scmp.ne.s32.totalorder %s322_s4, %s247_s26  ;;  %p251_p6 = scmp.lt.u32.totalorder %s247_s26, %s322_s4 }
 0x2b6   :  { %p253_p7 = pnand %p251_p6, %p248_p5 }
 0x2b8   :  { %256 = shalt.err (!%p253_p7)
}
 0x2b9   :  { %194 = dma.vmem_to_hbm [thread:$0]  %s192_s21, 128, %s322_s4, [#allocation4]  }
 0x2ba   :  { %257 = dma.done.wait [#allocation4], 128  }
 0x2bb   :  { %258 = vsyncadd [#allocation4], 4294967168 }
 0x2bc   :  { %198 = vsyncpa [#allocation4], 1 }

</bundles_post_ra>
